<compile_context>
chip_gen: v6e
topology: v6e:2x2x1
jax: 0.10.0
libtpu: 0.0.40
codegen_flags: <defaults>
</compile_context>

<pallas_src>
import functools

import jax
import jax.numpy as jnp
from jax.experimental import pallas as pl
from jax.experimental.pallas import tpu as pltpu


def _choose_tb(batch, seq):
    """Batches per grid step: fill the MXU M-dim but keep >= 2 grid steps."""
    tb = max(1, -(-256 // seq))          # aim for TB*S >= 256
    tb = min(tb, batch)
    if batch >= 2:
        tb = min(tb, max(1, batch // 2))  # >= 2 steps so v7x's 2 TCs both work
    tb = max(tb, 1)
    while batch % tb:                     # must divide the batch evenly
        tb -= 1
    return tb


def _vmem_limit_bytes():
    """~3/4 of physical VMEM (96 MiB on v5e/v6e, 48 MiB on v7x)."""
    default_cap = 64 * 1024 * 1024
    try:
        cap = getattr(pltpu.get_tpu_info(), "vmem_capacity_bytes", default_cap)
    except Exception:  # pragma: no cover - conservative fallback
        cap = default_cap
    return int(max(32 * 1024 * 1024, min(100 * 1024 * 1024, (cap * 3) // 4)))


def _self_attn_kernel(traj_ref, joint_ref, delta_ref, wqkv_ref, out_ref, *,
                      tb, seq, opad):
    blk = pl.program_id(0)

    joint = joint_ref[...]                        # (TB, S, E) bf16
    dsum = delta_ref[...]                         # (TB, S, S) bf16 additive bias

    # Fused lane-dense projection: one (TB*S, E) @ (E, 3*O_pad) bf16 MXU pass.
    qkv = jnp.dot(joint.reshape(tb * seq, joint.shape[-1]), wqkv_ref[...],
                  preferred_element_type=jnp.float32)
    qkv = qkv.reshape(tb, seq, 3 * opad).astype(jnp.bfloat16)
    # Each segment is padded to a 128-lane multiple -> aligned (free) slices.
    q = qkv[:, :, :opad]                          # (TB, S, O_pad)
    k = qkv[:, :, opad:2 * opad]                  # (TB, S, O_pad)
    v = qkv[:, :, 2 * opad:]                      # (TB, S, O_pad)

    # Scores: batched bf16 matmul with f32 accumulation, plus delta bias (f32).
    scores = jnp.einsum("bqd,bkd->bqk", q, k,
                        preferred_element_type=jnp.float32)
    scores = scores + dsum.astype(jnp.float32)

    # Row-wise softmax over keys (denominator includes masked columns,
    # matching the post-softmax multiplicative mask of the reference).
    scores = scores - jnp.max(scores, axis=-1, keepdims=True)
    p = jnp.exp(scores)
    inv = pl.reciprocal(jnp.sum(p, axis=-1, keepdims=True), approx=True)

    # Per-batch trajectory mask built from the SMEM-prefetched scalar,
    # fused with the normalization into a single select.
    row = jax.lax.broadcasted_iota(jnp.int32, (seq, seq), 0)
    col = jax.lax.broadcasted_iota(jnp.int32, (seq, seq), 1)
    masked = []
    for i in range(tb):                           # tb is static (small unroll)
        tl_i = traj_ref[blk * tb + i]
        keep = (row < tl_i) & (col < tl_i)
        masked.append(jnp.where(keep, p[i] * inv[i], 0.0))
    attn = jnp.stack(masked, axis=0).astype(jnp.bfloat16)   # (TB, S, S)
    # TODO(synk): training-mode dropout (inverted scaling + pltpu.prng_*) is
    # not implemented; nn.Dropout is identity in eval-mode forward.

    out = jnp.einsum("bqk,bkd->bqd", attn, v,
                     preferred_element_type=jnp.float32)     # (TB, S, O_pad)
    out_ref[...] = out.astype(out_ref.dtype)


def self_attn_dropout(joint, delta, traj_len, params):
    B, S, E = joint.shape
    O = params["wq"].shape[1]
    O_pad = ((O + 127) // 128) * 128
    TB = _choose_tb(B, S)

    # delta IS consumed (additive logit bias): reduce its tiny trailing dim
    # once in XLA and ship a lane-dense bf16 (B,S,S) slab (dominant stream).
    delta_sum = jnp.sum(delta, axis=-1).astype(jnp.bfloat16)

    # Fused Q/K/V weights; each segment zero-padded to a 128-lane boundary so
    # in-kernel slices (and the output store) are lane-aligned.
    def _pad(w):
        return jnp.pad(w, ((0, 0), (0, O_pad - O)))
    wqkv = jnp.concatenate(
        [_pad(params["wq"]), _pad(params["wk"]), _pad(params["wv"])],
        axis=1).astype(jnp.bfloat16)                         # (E, 3*O_pad)

    joint_bf = joint.astype(jnp.bfloat16)

    kernel = functools.partial(_self_attn_kernel, tb=TB, seq=S, opad=O_pad)
    out_padded = pl.pallas_call(
        kernel,
        out_shape=jax.ShapeDtypeStruct((B, S, O_pad), jnp.float32),
        grid_spec=pltpu.PrefetchScalarGridSpec(
            num_scalar_prefetch=1,                 # traj_len -> SMEM
            grid=(B // TB,),
            in_specs=[
                pl.BlockSpec((TB, S, E), lambda b, tl: (b, 0, 0)),        # joint
                pl.BlockSpec((TB, S, S), lambda b, tl: (b, 0, 0)),        # delta
                pl.BlockSpec((E, 3 * O_pad), lambda b, tl: (0, 0)),       # Wqkv
            ],
            out_specs=pl.BlockSpec((TB, S, O_pad), lambda b, tl: (b, 0, 0)),
        ),
        compiler_params=pltpu.CompilerParams(
            dimension_semantics=("parallel",),
            vmem_limit_bytes=_vmem_limit_bytes()),
    )(traj_len.astype(jnp.int32), joint_bf, delta_sum, wqkv)

    return out_padded[:, :, :O]


def _reference(joint, delta, traj_len, params):
    """Pure-JAX (f32) replica of the PyTorch forward (dropout = identity)."""
    B, S, E = joint.shape
    dsum = jnp.sum(delta, axis=-1)
    q = joint @ params["wq"]
    k = joint @ params["wk"]
    v = joint @ params["wv"]
    attn = jnp.einsum("bqd,bkd->bqk", q, k) + dsum
    attn = jax.nn.softmax(attn, axis=-1)
    idx = jnp.arange(S)
    row_ok = idx[None, :, None] < traj_len[:, None, None]
    col_ok = idx[None, None, :] < traj_len[:, None, None]
    attn = attn * (row_ok & col_ok).astype(jnp.float32)
    return jnp.einsum("bqk,bkd->bqd", attn, v)


if __name__ == "__main__":
    B, S, E, O, D = 4, 8, 32, 16, 3
    key = jax.random.PRNGKey(0)
    k_joint, k_delta, kq, kk, kv = jax.random.split(key, 5)

    lim = 1.0 / (E ** 0.5)   # PyTorch nn.Linear default init range
    params = {
        "wq": jax.random.uniform(kq, (E, O), jnp.float32, -lim, lim),
        "wk": jax.random.uniform(kk, (E, O), jnp.float32, -lim, lim),
        "wv": jax.random.uniform(kv, (E, O), jnp.float32, -lim, lim),
    }
    joint = jax.random.normal(k_joint, (B, S, E), jnp.float32)
    delta = jax.random.normal(k_delta, (B, S, S, D), jnp.float32)
    traj_len = jnp.array([6, 8, 3, 5], dtype=jnp.int32)

    out = self_attn_dropout(joint, delta, traj_len, params)
    out = jax.block_until_ready(out)

    ref = _reference(joint, delta, traj_len, params)
    assert out.shape == (B, S, O)
    # bf16 MXU path + approx reciprocal -> relaxed tolerance vs f32 reference.
    assert jnp.allclose(out, ref, atol=7e-2, rtol=7e-2), \
        float(jnp.max(jnp.abs(out - ref)))
    print("KERNEL_OK")
</pallas_src>

<mosaic_0001>
module attributes {stable_mosaic.version = 11 : i64} {
  func.func @_self_attn_kernel(%arg0: i32, %arg1: memref<4xi32, #tpu.memory_space<smem>>, %arg2: memref<2x8x32xbf16, #tpu.memory_space<vmem>>, %arg3: memref<2x8x8xbf16, #tpu.memory_space<vmem>>, %arg4: memref<32x384xbf16, #tpu.memory_space<vmem>>, %arg5: memref<2x8x128xf32, #tpu.memory_space<vmem>>) attributes {dimension_semantics = [#tpu.dimension_semantics<parallel>], iteration_bounds = array<i64: 2>, scalar_prefetch = 1 : i64, scratch_operands = 0 : i64, tpu.core_type = #tpu.core_type<tc>, window_params = [{transform_indices = @transform_0, window_bounds = array<i64: 2, 8, 32>}, {transform_indices = @transform_1, window_bounds = array<i64: 2, 8, 8>}, {pipeline_mode = #tpu.pipeline_mode<synchronous>, transform_indices = @transform_2, window_bounds = array<i64: 32, 384>}, {transform_indices = @transform_3, window_bounds = array<i64: 2, 8, 128>}]} {
    %c0 = arith.constant 0 : index
    %c0_0 = arith.constant 0 : index
    %c0_1 = arith.constant 0 : index
    %0 = vector.load %arg2[%c0, %c0_0, %c0_1] : memref<2x8x32xbf16, #tpu.memory_space<vmem>>, vector<2x8x32xbf16>
    %c0_2 = arith.constant 0 : index
    %c0_3 = arith.constant 0 : index
    %c0_4 = arith.constant 0 : index
    %1 = vector.load %arg3[%c0_2, %c0_3, %c0_4] : memref<2x8x8xbf16, #tpu.memory_space<vmem>>, vector<2x8x8xbf16>
    %2 = vector.shape_cast %0 : vector<2x8x32xbf16> to vector<16x32xbf16>
    %c0_5 = arith.constant 0 : index
    %c0_6 = arith.constant 0 : index
    %3 = vector.load %arg4[%c0_5, %c0_6] : memref<32x384xbf16, #tpu.memory_space<vmem>>, vector<32x384xbf16>
    %cst = arith.constant dense<0.000000e+00> : vector<16x384xf32>
    %4 = tpu.matmul %2, %3, %cst {dimension_numbers = #tpu.dot_dimension_numbers<[1], [0], [0], [1], [0, 0, 1, 1], [], []>} : vector<16x32xbf16>, vector<32x384xbf16>, vector<16x384xf32> -> vector<16x384xf32>
    %5 = vector.shape_cast %4 : vector<16x384xf32> to vector<2x8x384xf32>
    %6 = arith.truncf %5 : vector<2x8x384xf32> to vector<2x8x384xbf16>
    %7 = vector.extract_strided_slice %6 {offsets = [0, 0, 0], sizes = [2, 8, 128], strides = [1, 1, 1]} : vector<2x8x384xbf16> to vector<2x8x128xbf16>
    %8 = vector.extract_strided_slice %6 {offsets = [0, 0, 128], sizes = [2, 8, 128], strides = [1, 1, 1]} : vector<2x8x384xbf16> to vector<2x8x128xbf16>
    %9 = vector.extract_strided_slice %6 {offsets = [0, 0, 256], sizes = [2, 8, 128], strides = [1, 1, 1]} : vector<2x8x384xbf16> to vector<2x8x128xbf16>
    "tpu.trace_start"() <{level = 10 : i32, message = "bqd,bkd->bqk"}> : () -> ()
    %cst_7 = arith.constant dense<0.000000e+00> : vector<2x8x8xf32>
    %10 = tpu.matmul %7, %8, %cst_7 {dimension_numbers = #tpu.dot_dimension_numbers<[2], [2], [1], [1], [0, 0, 0, 1, 1, 1], [0], [0]>} : vector<2x8x128xbf16>, vector<2x8x128xbf16>, vector<2x8x8xf32> -> vector<2x8x8xf32>
    "tpu.trace_stop"() : () -> ()
    %11 = arith.extf %1 : vector<2x8x8xbf16> to vector<2x8x8xf32>
    %12 = arith.addf %10, %11 : vector<2x8x8xf32>
    %cst_8 = arith.constant dense<0xFF800000> : vector<2x8xf32>
    %13 = vector.multi_reduction <maximumf>, %12, %cst_8 [2] : vector<2x8x8xf32> to vector<2x8xf32>
    %14 = vector.shape_cast %13 : vector<2x8xf32> to vector<2x8x1xf32>
    %15 = vector.broadcast %14 : vector<2x8x1xf32> to vector<2x8x8xf32>
    %16 = arith.subf %12, %15 : vector<2x8x8xf32>
    %17 = math.exp %16 : vector<2x8x8xf32>
    %cst_9 = arith.constant dense<0.000000e+00> : vector<2x8xf32>
    %18 = vector.multi_reduction <add>, %17, %cst_9 [2] : vector<2x8x8xf32> to vector<2x8xf32>
    %19 = vector.shape_cast %18 : vector<2x8xf32> to vector<2x8x1xf32>
    %20 = tpu.reciprocal %19 {approx = true} : vector<2x8x1xf32> -> vector<2x8x1xf32>
    %21 = tpu.iota {dimensions = array<i32: 0>} : vector<8x8xi32>
    %22 = tpu.iota {dimensions = array<i32: 1>} : vector<8x8xi32>
    %c2_i32 = arith.constant 2 : i32
    %23 = arith.muli %arg0, %c2_i32 : i32
    %c0_i32 = arith.constant 0 : i32
    %24 = arith.addi %23, %c0_i32 : i32
    %25 = arith.index_cast %24 : i32 to index
    %26 = memref.load %arg1[%25] : memref<4xi32, #tpu.memory_space<smem>>
    %27 = vector.broadcast %26 : i32 to vector<8x8xi32>
    %28 = arith.cmpi slt, %21, %27 : vector<8x8xi32>
    %29 = vector.broadcast %26 : i32 to vector<8x8xi32>
    %30 = arith.cmpi slt, %22, %29 : vector<8x8xi32>
    %31 = arith.andi %28, %30 : vector<8x8xi1>
    %32 = vector.extract_strided_slice %17 {offsets = [0, 0, 0], sizes = [1, 8, 8], strides = [1, 1, 1]} : vector<2x8x8xf32> to vector<1x8x8xf32>
    %33 = vector.shape_cast %32 : vector<1x8x8xf32> to vector<8x8xf32>
    %34 = vector.extract_strided_slice %20 {offsets = [0, 0, 0], sizes = [1, 8, 1], strides = [1, 1, 1]} : vector<2x8x1xf32> to vector<1x8x1xf32>
    %35 = vector.shape_cast %34 : vector<1x8x1xf32> to vector<8x1xf32>
    %36 = vector.broadcast %35 : vector<8x1xf32> to vector<8x8xf32>
    %37 = arith.mulf %33, %36 : vector<8x8xf32>
    %cst_10 = arith.constant 0.000000e+00 : f32
    %38 = vector.broadcast %cst_10 : f32 to vector<8x8xf32>
    %39 = arith.select %31, %37, %38 : vector<8x8xi1>, vector<8x8xf32>
    %c2_i32_11 = arith.constant 2 : i32
    %40 = arith.muli %arg0, %c2_i32_11 : i32
    %c1_i32 = arith.constant 1 : i32
    %41 = arith.addi %40, %c1_i32 : i32
    %42 = arith.index_cast %41 : i32 to index
    %43 = memref.load %arg1[%42] : memref<4xi32, #tpu.memory_space<smem>>
    %44 = vector.broadcast %43 : i32 to vector<8x8xi32>
    %45 = arith.cmpi slt, %21, %44 : vector<8x8xi32>
    %46 = vector.broadcast %43 : i32 to vector<8x8xi32>
    %47 = arith.cmpi slt, %22, %46 : vector<8x8xi32>
    %48 = arith.andi %45, %47 : vector<8x8xi1>
    %49 = vector.extract_strided_slice %17 {offsets = [1, 0, 0], sizes = [1, 8, 8], strides = [1, 1, 1]} : vector<2x8x8xf32> to vector<1x8x8xf32>
    %50 = vector.shape_cast %49 : vector<1x8x8xf32> to vector<8x8xf32>
    %51 = vector.extract_strided_slice %20 {offsets = [1, 0, 0], sizes = [1, 8, 1], strides = [1, 1, 1]} : vector<2x8x1xf32> to vector<1x8x1xf32>
    %52 = vector.shape_cast %51 : vector<1x8x1xf32> to vector<8x1xf32>
    %53 = vector.broadcast %52 : vector<8x1xf32> to vector<8x8xf32>
    %54 = arith.mulf %50, %53 : vector<8x8xf32>
    %cst_12 = arith.constant 0.000000e+00 : f32
    %55 = vector.broadcast %cst_12 : f32 to vector<8x8xf32>
    %56 = arith.select %48, %54, %55 : vector<8x8xi1>, vector<8x8xf32>
    %57 = vector.shape_cast %39 : vector<8x8xf32> to vector<1x8x8xf32>
    %58 = vector.shape_cast %56 : vector<8x8xf32> to vector<1x8x8xf32>
    %59 = tpu.concatenate %57, %58 in 0 : vector<1x8x8xf32>, vector<1x8x8xf32> -> vector<2x8x8xf32>
    %60 = arith.truncf %59 : vector<2x8x8xf32> to vector<2x8x8xbf16>
    "tpu.trace_start"() <{level = 10 : i32, message = "bqk,bkd->bqd"}> : () -> ()
    %cst_13 = arith.constant dense<0.000000e+00> : vector<2x8x128xf32>
    %61 = tpu.matmul %60, %9, %cst_13 {dimension_numbers = #tpu.dot_dimension_numbers<[2], [1], [1], [2], [0, 0, 0, 1, 1, 2], [0], [0]>} : vector<2x8x8xbf16>, vector<2x8x128xbf16>, vector<2x8x128xf32> -> vector<2x8x128xf32>
    "tpu.trace_stop"() : () -> ()
    %c0_14 = arith.constant 0 : index
    %c0_15 = arith.constant 0 : index
    %c0_16 = arith.constant 0 : index
    %62 = vector.load %arg5[%c0_14, %c0_15, %c0_16] : memref<2x8x128xf32, #tpu.memory_space<vmem>>, vector<2x8x128xf32>
    tpu.vector_store %arg5[%c0_14, %c0_15, %c0_16], %61 {strides = array<i32>} : memref<2x8x128xf32, #tpu.memory_space<vmem>>, vector<2x8x128xf32>,
    return
  }
  func.func @transform_0(%arg0: i32, %arg1: memref<4xi32, #tpu.memory_space<smem>>) -> (i32, i32, i32) {
    %c0_i32 = arith.constant 0 : i32
    %c0_i32_0 = arith.constant 0 : i32
    %c0_i32_1 = arith.constant 0 : i32
    return %arg0, %c0_i32, %c0_i32_0 : i32, i32, i32
  }
  func.func @transform_1(%arg0: i32, %arg1: memref<4xi32, #tpu.memory_space<smem>>) -> (i32, i32, i32) {
    %c0_i32 = arith.constant 0 : i32
    %c0_i32_0 = arith.constant 0 : i32
    %c0_i32_1 = arith.constant 0 : i32
    return %arg0, %c0_i32, %c0_i32_0 : i32, i32, i32
  }
  func.func @transform_2(%arg0: i32, %arg1: memref<4xi32, #tpu.memory_space<smem>>) -> (i32, i32) {
    %c0_i32 = arith.constant 0 : i32
    %c0_i32_0 = arith.constant 0 : i32
    %c0_i32_1 = arith.constant 0 : i32
    return %c0_i32, %c0_i32_0 : i32, i32
  }
  func.func @transform_3(%arg0: i32, %arg1: memref<4xi32, #tpu.memory_space<smem>>) -> (i32, i32, i32) {
    %c0_i32 = arith.constant 0 : i32
    %c0_i32_0 = arith.constant 0 : i32
    %c0_i32_1 = arith.constant 0 : i32
    return %arg0, %c0_i32, %c0_i32_0 : i32, i32, i32
  }
}

</mosaic_0001>

<bundles_post_ra>
// kernel: tpu_custom_call.1
= control target key start
LH: loop header
LB: loop body
LE: loop exit
PB: predicated region body
PF: predicated region fallthrough
CT: control target
= control target key end

     0   :  { %s1071_s15 = smov [#allocation3]   ;;  %s1361_s0 = inlined_call_operand.hbm [shape: s32[4], index: 0, kind: input, shape index: {}]   ;;  %s1362_s1 = inlined_call_operand.hbm [shape: bf16[4,8,32], index: 1, kind: input, shape index: {}]   ;;  %s1363_s2 = inlined_call_operand.hbm [shape: bf16[4,8,8], index: 2, kind: input, shape index: {}]   ;;  %s1364_s3 = inlined_call_operand.hbm [shape: bf16[32,384], index: 3, kind: input, shape index: {}]   ;;  %s1365_s4 = inlined_call_operand.hbm [shape: f32[4,8,128], index: 4, kind: output, shape index: {}]  }
   0x1   :  { %10 = dma.hbm_to_smem %s1361_s0, 16, %s1071_s15, [#allocation2] }
   0x2   :  { %1037 = dma.done.wait [#allocation2], 16 }
   0x3   :  { %1038 = vsyncadd [#allocation2], 4294967280 }
   0x4   :  { %12 = sfence }
   0x5   :  { %13 = vsyncpa [#allocation5], 0 }
   0x6   :  { %15 = vsyncpa [#allocation5 + $0x1], 0 }
   0x7   :  { %16 = vsyncpa [#allocation8], 0 }
   0x8   :  { %18 = vsyncpa [#allocation8 + $0x1], 0 }
   0x9   :  { %19 = vsyncpa [#allocation6], 0 }
   0xa   :  { %21 = vsyncpa [#allocation6 + $0x1], 0  ;;  %s1113_s18 = smov 0   ;;  %s1115_s19 = smov 0  }
   0xb   :  { %s1117_s20 = smov 0   ;;  %s1119_s21 = smov 0  }
   0xc LB: > { %s1134_s0 = sadd.s32 4294967295, %s1069_s21   ;;  %s734_s22 = sadd.s32 4294967294, %s1069_s21   ;;  %s1069_s21 = sphi %s1119_s21, %s1385_s21   ;;  %s1065_s20 = sphi %s1117_s20, %s1384_s20   ;;  %s1061_s19 = sphi %s1115_s19, %s1383_s19   ;;  %s1057_s18 = sphi %s1113_s18, %s1382_s18  }
   0xd   : > { %p47_p0 = scmp.ne.s32.totalorder %s1061_s19, %s1057_s18  ;;  %p1366_p1 = scmp.eq.s32.totalorder %s1134_s0, 0 }
   0xe   : > { %p124_p3 = scmp.eq.s32.totalorder %s734_s22, 1  ;;  %p735_p5 = scmp.ge.s32.totalorder %s1069_s21, 1 }
   0xf   : > { %p1143_p4 = por %p1366_p1, %p47_p0  ;;  %p131_p7 = scmp.lt.s32.totalorder %s1069_s21, 3 }
  0x10   : > { %p1148_p6 = por %p124_p3, %p47_p0  ;;  %s1072_s26 = smov [#allocation9]  }
  0x11   : > { %s1369_s23 = scalar_select %p1143_p4, 1, 0 }
  0x12   : > { %s1370_s24 = scalar_select %p1148_p6, 1, 0 }
  0x13   : > { %p1153_p8 = pnand %p735_p5, %p131_p7  ;;  %s143_s27 = sshll.u32 %s1072_s26, 4  ;;  %s144_s27 = int_to_ptr.vmem [resolvable:$true] %s143_s27 }
  0x14   : > { %s1167_s29 = sadd.s32 1, %s1069_s21   ;;  %s34_s30 = sadd.s32 1, %s1065_s20 }
  0x15   : > { %p826_p9 = pneg %p1153_p8  ;;  %s31_s5 = ssub.s32 %s1069_s21, %s1167_s29 }
  0x16   : > { %s924_s6 = scalar_lea.vmem %s144_s27, 768  ;;  %p932_p5 = scmp.lt.s32.totalorder %s144_s27, %s144_s27 }
  0x17   : > { %p1162_p11 = pnand %p826_p9, %p1366_p1  ;;  %p925_p13 = scmp.ne.s32.totalorder %s144_s27, %s924_s6 }
  0x18   : > { %p933_p7 = scmp.lt.s32.totalorder %s924_s6, %s924_s6 }
  0x19   : > { %p915_p12 = pneg %p1162_p11 }
  0x1a   : > { %p934_p10 = por %p933_p7, %p932_p5 }
  0x1b   : > { %p927_p0 = pnand %p925_p13, %p915_p12 }
  0x1d   : > { %p928_p3 = pneg %p927_p0 }
  0x1f   : > { %p935_p2 = pnand %p934_p10, %p928_p3 }
  0x21   : > { %938 = shalt.err (!%p935_p2)
}
  0x22   : > { %s1073_s7 = smov 192   ;;  %s1074_s8 = smov 12  }
  0x23   : > { %829 = dma.hbm_to_vmem [thread:$0]  (!%p1162_p11), %s1364_s3, 768, %s144_s27, [#allocation8], %s1073_s7, %s1073_s7, %s1074_s8  }
  0x24   : > { %p32_p9 = scmp.eq.s32.totalorder %s31_s5, 0  ;;  %p41_p10 = scmp.ne.s32.totalorder %s1065_s20, %s1061_s19 }
  0x25   : > { %p42_p2 = scmp.eq.s32.totalorder %s1069_s21, 0  ;;  %p842_p12 = scmp.lt.s32.totalorder %s1069_s21, 2 }
  0x26   : > { %s1184_s11 = scalar_select %p32_p9, %s1065_s20, %s34_s30  }
  0x27   : > { %p43_p13 = por %p42_p2, %p41_p10  ;;  %p1373_p0 = scmp.eq.s32.totalorder %s1134_s0, 1 }
  0x28   : > { %s157_s13 = sand.u32 1, %s1065_s20   ;;  %s766_s14 = sshll.u32 %s1069_s21, 7 }
  0x29   : > { %p1188_p3 = por %p1373_p0, %p41_p10  ;;  %s1194_s15 = sshll.u32 %s157_s13, 3 }
  0x2a   : > { %s1201_s22 = scalar_lea.hbm %s1362_s1, %s766_s14  ;;  %s161_s26 = scalar_lea.vmem [#allocation4], %s1194_s15 }
  0x2b   : > { %s1374_s12 = scalar_select %p1188_p3, 1, 0 }
  0x2c   : > { %s168_s27 = sshll.u32 %s161_s26, 4  ;;  %p1204_p11 = pnand %p842_p12, %p43_p13  ;;  %s1208_s27 = int_to_ptr.vmem [resolvable:$true] %s168_s27 }
  0x2d   : > { %s1210_s30 = scalar_lea.sflag [#allocation5], %s157_s13  ;;  %s939_s5 = scalar_lea.hbm %s1201_s22, 128 }
  0x2e   : > { %p940_p5 = scmp.ne.s32.totalorder %s1201_s22, %s939_s5  ;;  %p941_p7 = pneg %p1204_p11 }
  0x2f   : > { %s944_s8 = scalar_lea.hbm %s1362_s1, 256  ;;  %p945_p2 = scmp.lt.s32.totalorder %s1201_s22, %s1362_s1 }
  0x30   : > { %p942_p9 = pnand %p941_p7, %p940_p5  ;;  %p946_p12 = scmp.lt.s32.totalorder %s944_s8, %s939_s5 }
  0x32   : > { %p943_p10 = pneg %p942_p9  ;;  %p947_p13 = por %p946_p12, %p945_p2 }
  0x34   : > { %p948_p0 = pnand %p947_p13, %p943_p10 }
  0x36   : > { %951 = shalt.err (!%p948_p0)
}
  0x37   : > { %s952_s13 = scalar_lea.vmem %s1208_s27, 128  ;;  %s1075_s16 = smov [#allocation4]  }
  0x38   : > { %p953_p1 = scmp.ne.s32.totalorder %s1208_s27, %s952_s13  ;;  %s957_s17 = sshll.u32 %s1075_s16, 4  ;;  %s958_s17 = int_to_ptr.vmem [resolvable:$false] %s957_s17 }
  0x39   : > { %s959_s26 = scalar_lea.vmem %s958_s17, 256  ;;  %p960_p6 = scmp.lt.s32.totalorder %s1208_s27, %s958_s17 }
  0x3a   : > { %p955_p5 = pnand %p953_p1, %p941_p7  ;;  %p961_p3 = scmp.lt.s32.totalorder %s959_s26, %s952_s13 }
  0x3c   : > { %p956_p9 = pneg %p955_p5  ;;  %p962_p4 = por %p961_p3, %p960_p6 }
  0x3e   : > { %p963_p2 = pnand %p962_p4, %p956_p9 }
  0x40   : > { %966 = shalt.err (!%p963_p2)
}
  0x41   : > { %s1076_s5 = smov 64   ;;  %s1077_s6 = smov 4  }
  0x42   : > { %833 = dma.hbm_to_vmem [thread:$0]  (!%p1204_p11), %s1201_s22, 128, %s1208_s27, %s1210_s30, %s1076_s5, %s1076_s5, %s1077_s6  }
  0x43   : > { %s1245_s9 = scalar_lea.hbm %s1363_s2, %s766_s14  ;;  %s182_s10 = scalar_lea.vmem [#allocation7], %s1194_s15 }
  0x44   : > { %s189_s13 = sshll.u32 %s182_s10, 4  ;;  %s178_s16 = sand.u32 1, %s1069_s21   ;;  %s1249_s13 = int_to_ptr.vmem [resolvable:$true] %s189_s13 }
  0x45   : > { %s179_s17 = scalar_lea.sflag [#allocation8], %s178_s16  ;;  %s967_s26 = scalar_lea.hbm %s1245_s9, 128 }
  0x46   : > { %p968_p1 = scmp.ne.s32.totalorder %s1245_s9, %s967_s26  ;;  %s972_s14 = scalar_lea.hbm %s1363_s2, 256 }
  0x47   : > { %p973_p3 = scmp.lt.s32.totalorder %s1245_s9, %s1363_s2  ;;  %p974_p10 = scmp.lt.s32.totalorder %s972_s14, %s967_s26 }
  0x48   : > { %p970_p4 = pnand %p968_p1, %p941_p7 }
  0x49   : > { %p975_p12 = por %p974_p10, %p973_p3 }
  0x4a   : > { %p971_p6 = pneg %p970_p4 }
  0x4c   : > { %p976_p13 = pnand %p975_p12, %p971_p6 }
  0x4e   : > { %979 = shalt.err (!%p976_p13)
}
  0x4f   : > { %s980_s15 = scalar_lea.vmem %s1249_s13, 128  ;;  %s1078_s8 = smov [#allocation7]  }
  0x50   : > { %p981_p0 = scmp.ne.s32.totalorder %s1249_s13, %s980_s15  ;;  %s985_s10 = sshll.u32 %s1078_s8, 4  ;;  %s986_s10 = int_to_ptr.vmem [resolvable:$false] %s985_s10 }
  0x51   : > { %s987_s16 = scalar_lea.vmem %s986_s10, 256  ;;  %p988_p2 = scmp.lt.s32.totalorder %s1249_s13, %s986_s10 }
  0x52   : > { %p983_p5 = pnand %p981_p0, %p941_p7  ;;  %p989_p1 = scmp.lt.s32.totalorder %s987_s16, %s980_s15 }
  0x54   : > { %p984_p9 = pneg %p983_p5  ;;  %p990_p4 = por %p989_p1, %p988_p2 }
  0x56   : > { %p991_p3 = pnand %p990_p4, %p984_p9 }
  0x58   : > { %994 = shalt.err (!%p991_p3)
}
  0x59   : > { %836 = dma.hbm_to_vmem [thread:$0]  (!%p1204_p11), %s1245_s9, 128, %s1249_s13, %s179_s17, %s1076_s5, %s1076_s5, %s1077_s6  }
  0x5a   : > { %201 = sbr.rel (%p1153_p8) target bundleno = 1039 (0x40f), region = 32  ;;  %s1279_s26 = sand.u32 (!%p1153_p8), 1, %s1061_s19  }
  0x5b   : > { %s745_s22 = sshll.u32 (!%p1153_p8), %s1279_s26, 3  ;;  %s204_s27 = scalar_lea.sflag (!%p1153_p8), [#allocation5], %s1279_s26 }
  0x5c   : > { %s207_s14 = scalar_lea.vmem (!%p1153_p8), [#allocation4], %s745_s22  ;;  %p1376_p7 = scmp.ne.s32.totalorder (!%p1153_p8), %s1369_s23, 0 }
  0x5f   : > { %1040 = dma.done.wait (%p1376_p7), %s204_s27, 128  }
  0x60   : > { %1042 = vsyncadd (%p1376_p7), %s204_s27, 4294967168  ;;  %s212_s28 = sand.u32 1, %s1134_s0   ;;  %s1288_s25 = scalar_lea.vmem [#allocation7], %s745_s22 }
  0x61   : > { %s213_s5 = scalar_lea.sflag [#allocation8], %s212_s28 }
  0x62   : > { %1044 = dma.done.wait (%p1376_p7), %s213_s5, 128  }
  0x63   : > { %1046 = vsyncadd (%p1376_p7), %s213_s5, 4294967168  ;;  %p1377_p8 = scmp.eq.s32.totalorder %s1134_s0, 0 }
  0x65   : > { %1048 = dma.done.wait (%p1377_p8), [#allocation8], 768   ;;  %p1378_p11 = pmov %p1377_p8 }
  0x66   : > { %v1079_v0 = vmov 0   ;;  %v1080_v1 = vmov 0.0   ;;  %v888_v2 = vld [vmem:[#allocation9 + $0x1c] ss:$12 sps:$4 sm:$0xff]   ;;  %v890_v3 = vld [vmem:[#allocation9 + $0x18] ss:$12 sps:$4 sm:$0xff]   ;;  %v498_v51 = vlaneseq }
  0x67   : > { %1050 = vsyncadd (%p1378_p11), [#allocation8], 4294966528  ;;  %337 = vmatprep.mubr.bf16.mxu0 %v1079_v0  ;;  %784 = vmatprep.subr.bf16.mxu1 %v1080_v1  ;;  %v891_v4 = vld [vmem:[#allocation9 + $0x4] ss:$12 sps:$4 sm:$0xff]   ;;  %v893_v5 = vld [vmem:[#allocation9] ss:$12 sps:$4 sm:$0xff]  }
  0x68   : > { %317 = vmatprep.subr.bf16.mxu0 %v888_v2  ;;  %v895_v6 = vld [vmem:[#allocation9 + $0x20] ss:$12 sps:$4 sm:$0xff]   ;;  %vm301_vm0 = vcmask 261120   ;;  %v896_v8 = vld [vmem:[#allocation9 + $0x8] ss:$12 sps:$4 sm:$0xff]   ;;  %vm1081_vm1 = vmmov 0  }
  0x69   : > { %318 = vmatpush1.bf16.msra.mxu0 %v890_v3  ;;  %v894_v7 = vld [vmem:[%s207_s14] sm:$0xff]   ;;  %785 = vmatpush3.bf16.msra.mxu1 %v895_v6  ;;  %vm523_vm2 = vcmask 1043456   ;;  %v770_v25 = vld [vmem:[%s1288_s25] sm:$0xff]   ;;  %vm477_vm3 = vcmask 64512   ;;  %s758_s23 = sshll.u32 %s1134_s0, 1  ;;  %v499_v53 = vshrl.u32 %v498_v51, 7 }
  0x6a   : > { %319 = vmatprep.subr.bf16.mxu0 %v891_v4  ;;  %786 = vmatprep.subr.bf16.mxu1 %v1080_v1  ;;  %v771_v26 = vunpack.c.l.bf16 %v770_v25  ;;  %v772_v29 = vunpack.c.h.bf16 %v770_v25  ;;  %s503_s6 = sld [smem:[#allocation3 + %s758_s23]]  ;;  %s510_s9 = sadd.s32 1, %s758_s23  ;;  %v501_v54 = vand.u32 127, %v498_v51 }
  0x6b   : > { %788 = vmatprep.mubr.msk.bf16.mxu1 %vm1081_vm1, %v1080_v1  ;;  %s511_s13 = sld [smem:[#allocation3 + %s510_s9]]  ;;  %s748_s17 = sshll.u32 %s1279_s26, 4 }
  0x6c   : > { %s247_s30 = scalar_lea.vmem [#allocation10], %s748_s17  ;;  %s768_s15 = sshll.u32 %s1134_s0, 8 }
  0x6d   : > { %320 = vmatpush1.bf16.msra.mxu0 %v893_v5  ;;  %787 = vmatpush3.bf16.msra.mxu1 %v896_v8  ;;  %s629_s7 = sshll.u32 %s247_s30, 4  ;;  %s1318_s16 = scalar_lea.hbm %s1365_s4, %s768_s15  ;;  %s1313_s7 = int_to_ptr.vmem [resolvable:$true] %s629_s7 }
  0x6e   : > { %792 = vmatprep.subr.bf16.mxu0 %v1080_v1  ;;  %798 = vmatprep.subr.bf16.mxu1 %v1080_v1  ;;  %s616_s22 = scalar_lea.sflag [#allocation6], %s1279_s26  ;;  %s995_s0 = scalar_lea.vmem %s1313_s7, 256 }
  0x6f   : > { %p996_p6 = scmp.ne.s32.totalorder %s1313_s7, %s995_s0  ;;  %p1379_p10 = scmp.ne.s32.totalorder %s1374_s12, 0 }
  0x70   : > { %756 = vmatmul.mubr.msk.bf16.vlgmr.msra.gmra.mxu0 %vm301_vm0, %v894_v7  ;;  %789 = vmatmul.mubr.msk.bf16.vlgmr.msra.gmra.mxu1 %vm301_vm0, %v894_v7  ;;  %v504_v55 = vstv %s503_s6  ;;  %s1082_s27 = smov [#allocation10]  }
  0x71   : > { %794 = vmatprep.mubr.msk.bf16.mxu0 %vm1081_vm1, %v1080_v1  ;;  %800 = vmatprep.mubr.msk.bf16.mxu1 %vm1081_vm1, %v1080_v1  ;;  %vm505_vm4 = vcmp.lt.s32.totalorder %v499_v53, %v504_v55  ;;  %vm506_vm5 = vcmp.lt.s32.totalorder %v501_v54, %v504_v55  ;;  %v512_v56 = vstv %s511_s13  ;;  %p997_p12 = pnand %p996_p6, %p1379_p10  ;;  %s999_s14 = sshll.u32 %s1082_s27, 4  ;;  %s1000_s14 = int_to_ptr.vmem [resolvable:$false] %s999_s14 }
  0x72   : > { %vm507_vm6 = vmand %vm505_vm4, %vm506_vm5  ;;  %vm513_vm7 = vcmp.lt.s32.totalorder %v499_v53, %v512_v56  ;;  %vm514_vm8 = vcmp.lt.s32.totalorder %v501_v54, %v512_v56  ;;  %s1001_s28 = scalar_lea.vmem %s1000_s14, 512  ;;  %p1002_p0 = scmp.lt.s32.totalorder %s1313_s7, %s1000_s14 }
  0x73   : > { %vm515_vm9 = vmand %vm513_vm7, %vm514_vm8  ;;  %p998_p13 = pneg %p997_p12  ;;  %p1003_p5 = scmp.lt.s32.totalorder %s1001_s28, %s995_s0 }
  0x75   : > { %p1004_p9 = por %p1003_p5, %p1002_p0 }
  0x77   : > { %p1005_p2 = pnand %p1004_p9, %p998_p13 }
 0x130   : > { %v339_v9 = vpop.f32.mrf.mxu0  ;;  %v382_v17 = vpop.f32.mrf.mxu1 }
 0x131   : > { %v389_v15 = vpack.c.bf16 %v339_v9, %v339_v9  ;;  %v391_v18 = vpack.c.bf16 %v382_v17, %v382_v17 }
 0x132   : > { %v341_v10 = vpop.f32.mrf.mxu0  ;;  %v790_v19 = vpop.f32.mrf.mxu1 }
 0x133   : > { %v390_v11 = vpack.c.bf16 %v341_v10, %v341_v10  ;;  %v525_v20 = vsel %vm523_vm2, %v391_v18, 0 }
 0x134   : > { %v343_v12 = vpop.f32.mrf.mxu0  ;;  %v385_v21 = vpop.f32.mrf.mxu1 }
 0x135   : > { %793 = vmatpush3.bf16.xpose.msra.mxu0 %v390_v11  ;;  %v392_v16 = vpack.c.bf16 %v343_v12, %v343_v12  ;;  %v394_v22 = vpack.c.bf16 %v385_v21, %v385_v21 }
 0x136   : > { %v345_v13 = vpop.f32.mrf.mxu0  ;;  %804 = vmatprep.subr.bf16.mxu0 %v1080_v1  ;;  %v791_v23 = vpop.f32.mrf.mxu1 }
 0x137   : > { %v393_v14 = vpack.c.bf16 %v345_v13, %v345_v13  ;;  %v571_v24 = vsel %vm523_vm2, %v394_v22, 0 }
 0x139   : > { %799 = vmatpush3.bf16.xpose.msra.mxu1 %v393_v14 }
 0x13a   : > { %810 = vmatprep.subr.bf16.mxu1 %v1080_v1 }
 0x13c   : > { %795 = vmatmul.mubr.bf16.vlgmr.msra.gmra.mxu0 %v389_v15 }
 0x13d   : > { %806 = vmatprep.mubr.msk.bf16.mxu0 %vm1081_vm1, %v1080_v1  ;;  %805 = vmatpush3.bf16.msra.mxu0 %v525_v20 }
 0x140   : > { %801 = vmatmul.mubr.bf16.vlgmr.msra.gmra.mxu1 %v392_v16 }
 0x141   : > { %812 = vmatprep.mubr.msk.bf16.mxu1 %vm1081_vm1, %v1080_v1  ;;  %811 = vmatpush3.bf16.msra.mxu1 %v571_v24 }
 0x1fc   : > { %v431_v27 = vpop.f32.mrf.mxu0 }
 0x1fd   : > { %v432_v28 = vadd.f32 %v771_v26, %v431_v27 }
 0x1fe   : > { %v796_v30 = vpop.f32.mrf.mxu0 }
 0x1ff   : > { %v478_v31 = vsel %vm477_vm3, %v432_v28, -inf }
 0x200   : > { %479 = vmax.xlane.f32.xlu0 %v478_v31  ;;  %v434_v32 = vpop.f32.mrf.mxu0  ;;  %v471_v33 = vpop.f32.mrf.mxu1 }
 0x201   : > { %v472_v34 = vadd.f32 %v772_v29, %v471_v33 }
 0x202   : > { %v797_v35 = vpop.f32.mrf.mxu0  ;;  %v802_v36 = vpop.f32.mrf.mxu1 }
 0x203   : > { %v481_v37 = vsel %vm477_vm3, %v472_v34, -inf }
 0x204   : > { %482 = vmax.xlane.f32.xlu0 %v481_v37  ;;  %v474_v38 = vpop.f32.mrf.mxu1 }
 0x206   : > { %v803_v39 = vpop.f32.mrf.mxu1 }
 0x289   : > { %v480_v40 = vpop.xlane.xlu0 %479 }
 0x28a   : > { %v484_v41 = vsub.f32 %v432_v28, %v480_v40 }
 0x28c   : > { %v486_v42 = vmul.f32 1.442695, %v484_v41 }
 0x28d   : > { %v483_v43 = vpop.xlane.xlu0 %482 }
 0x28e   : > { %897 = vpow2.f32 %v486_v42  ;;  %v485_v44 = vsub.f32 %v472_v34, %v483_v43 }
 0x290   : > { %v488_v45 = vmul.f32 1.442695, %v485_v44 }
 0x292   : > { %899 = vpow2.f32 %v488_v45 }
 0x29b   : > { %v898_v46 = vpop.eup %897 }
 0x29c   : > { %v490_v47 = vsel %vm477_vm3, %v898_v46, 0.0 }
 0x29d   : > { %491 = vadd.xlane.f32.xlu1 %v490_v47 }
 0x29f   : > { %v900_v48 = vpop.eup %899 }
 0x2a0   : > { %v493_v49 = vsel %vm477_vm3, %v900_v48, 0.0 }
 0x2a1   : > { %494 = vadd.xlane.f32.xlu1 %v493_v49 }
 0x326   : > { %v492_v50 = vpop.xlane.xlu1 %491 }
 0x327   : > { %901 = vrcp.f32 %v492_v50 }
 0x32a   : > { %v495_v52 = vpop.xlane.xlu1 %494 }
 0x32b   : > { %903 = vrcp.f32 %v495_v52 }
 0x334   : > { %v902_v57 = vpop.eup %901 }
 0x335   : > { %v508_v58 = vmul.f32 %v902_v57, %v898_v46 }
 0x337   : > { %v509_v59 = vsel %vm507_vm6, %v508_v58, 0.0 }
 0x338   : > { %v904_v60 = vpop.eup %903  ;;  %v518_v61 = vpack.c.bf16 %v509_v59, %v509_v59 }
 0x339   : > { %v516_v62 = vmul.f32 %v904_v60, %v900_v48 }
 0x33a   : > { %807 = vmatmul.mubr.msk.bf16.vlgmr.msra.gmra.mxu0 %vm477_vm3, %v518_v61 }
 0x33b   : > { %v517_v63 = vsel %vm515_vm9, %v516_v62, 0.0 }
 0x33c   : > { %v519_v0 = vpack.c.bf16 %v517_v63, %v517_v63 }
 0x33e   : > { %813 = vmatmul.mubr.msk.bf16.vlgmr.msra.gmra.mxu1 %vm477_vm3, %v519_v0 }
 0x3fa   : > { %v561_v1 = vpop.f32.mrf.mxu0 }
 0x3fb   : > { %613 = vst [vmem:[%s247_s30] sm:$0xff] %v561_v1 }
 0x3fc   : > { %v808_v2 = vpop.f32.mrf.mxu0 }
 0x3fe   : > { %v564_v3 = vpop.f32.mrf.mxu0  ;;  %v607_v4 = vpop.f32.mrf.mxu1 }
 0x3ff   : > { %614 = vst [vmem:[%s247_s30 + $0x8] sm:$0xff] %v607_v4 }
 0x400   : > { %v809_v5 = vpop.f32.mrf.mxu0  ;;  %v814_v6 = vpop.f32.mrf.mxu1 }
 0x401   : > { %1008 = shalt.err (!%p1005_p2)
}
 0x402   : > { %s1009_s5 = scalar_lea.hbm %s1318_s16, 256  ;;  %s1013_s6 = scalar_lea.hbm %s1365_s4, 512 }
 0x403   : > { %p1010_p1 = scmp.ne.s32.totalorder %s1318_s16, %s1009_s5  ;;  %p1014_p7 = scmp.lt.s32.totalorder %s1318_s16, %s1365_s4 }
 0x404   : > { %p1015_p8 = scmp.lt.s32.totalorder %s1013_s6, %s1009_s5 }
 0x405   : > { %p1011_p4 = pnand %p1010_p1, %p1379_p10 }
 0x406   : > { %p1016_p11 = por %p1015_p8, %p1014_p7 }
 0x407   : > { %p1012_p3 = pneg %p1011_p4 }
 0x409   : > { %p1017_p6 = pnand %p1016_p11, %p1012_p3 }
 0x40b   : > { %1020 = shalt.err (!%p1017_p6)
}
 0x40c   : > { %s1083_s17 = smov 128   ;;  %s1084_s30 = smov 8   ;;  %v610_v7 = vpop.f32.mrf.mxu1 }
 0x40d   : > { %824 = dma.vmem_to_hbm [thread:$0]  (%p1379_p10), %s1313_s7, 256, %s1318_s16, %s616_s22, %s1083_s17, %s1083_s17, %s1084_s30  }
 0x40e   : > { %v815_v8 = vpop.f32.mrf.mxu1 }
 0x40f PF: > { %s644_s15 = sand.u32 1, %s1057_s18   ;;  %p1380_p12 = scmp.ne.s32.totalorder %s1370_s24, 0 }
 0x410   : > { %p1381_p13 = scmp.ge.s32.totalorder %s1069_s21, 2  ;;  %s645_s8 = scalar_lea.sflag [#allocation6], %s644_s15 }
 0x412   : > { %p838_p0 = pnand %p1381_p13, %p1380_p12 }
 0x414   : > { %p839_p5 = pneg %p838_p0 }
 0x416   : > { %1052 = dma.done.wait (%p839_p5), %s645_s8, 256  }
 0x417   : > { %1054 = vsyncadd (%p839_p5), %s645_s8, 4294967040  ;;  %p24_p10 = scmp.ge.s32.totalorder %s1167_s29, 4   ;;  %s1382_s18 = smov %s1061_s19 }
 0x418   : > { %s1383_s19 = smov %s1065_s20  ;;  %s1384_s20 = smov %s1184_s11 }
 0x419   : > { %s1385_s21 = smov %s1167_s29  ;;  %26 = sbr.rel (!%p24_p10) target bundleno = 12 (0xc), region = 94 }
 0x41e   :  { %650 = vsyncpa [#allocation5], 1 }
 0x41f   :  { %652 = vsyncpa [#allocation5 + $0x1], 1 }
 0x420   :  { %653 = vsyncpa [#allocation8], 1 }
 0x421   :  { %655 = vsyncpa [#allocation8 + $0x1], 1 }
 0x422   :  { %656 = vsyncpa [#allocation6], 1 }
 0x423   :  { %658 = vsyncpa [#allocation6 + $0x1], 1 }

</bundles_post_ra>
